<compile_context>
chip_gen: v7x
topology: tpu7x:2x2x1
jax: 0.10.0
libtpu: 0.0.40
codegen_flags: <defaults>
</compile_context>

<pallas_src>
import jax
import jax.numpy as jnp
from jax.experimental import pallas as pl
from jax.experimental.pallas import tpu as pltpu


# ------------------------------- Pallas kernel --------------------------------

def _fused_decoder_kernel(trunk_cols_ref, task_cols_ref,
                          wt_ref, bt_ref, ws_ref, bs_ref,
                          w1t_ref, b1_ref, w1s_ref, w2_ref, b2_ref,
                          trunk_out_ref, att_out_ref):
    """One grid step = (batch element, pixel tile). All intermediates stay in VMEM.

    Shapes (channels on sublanes, TP pixels on the 128-lane axis):
      trunk_cols_ref: (1, 9*Cin, TP)        bf16   im2col of input_trunk (this pixel tile)
      task_cols_ref : (1, 1, 9*F, T*TP)     bf16   im2col of upsampled task inputs,
                                                   tasks concatenated along lanes
      wt_ref / ws_ref: (Fn, 9*Cin)/(Fn, 9*F) bf16  BN-folded conv weights
      bt_ref / bs_ref: (Fn, 1)               f32   BN-folded conv offsets
      w1t_ref        : (T*Fn, Fn)            bf16  trunk halves of the 1st 1x1 att conv, stacked
      b1_ref         : (T*Fn, 1)             f32
      w1s_ref        : (T, Fn, Fn)           bf16  shared halves of the 1st 1x1 att conv
      w2_ref / b2_ref: (T, Fn, Fn) / (T, Fn, 1)
      trunk_out_ref  : (1, Fn, TP)
      att_out_ref    : (T, 1, Fn, TP)
    """
    n_tasks = att_out_ref.shape[0]
    fn = trunk_out_ref.shape[1]
    tp = trunk_out_ref.shape[2]

    # attented_layer (modeled): 3x3 conv as ONE im2col matmul + folded BN + ReLU.
    trunk = jnp.dot(wt_ref[...], trunk_cols_ref[0],
                    preferred_element_type=jnp.float32) + bt_ref[...]
    trunk = jnp.maximum(trunk, 0.0)                               # (Fn, TP) f32, lane-dense
    trunk_out_ref[0] = trunk.astype(trunk_out_ref.dtype)
    trunk_bf = trunk.astype(jnp.bfloat16)

    # shared_feature_extractor for ALL tasks in ONE matmul (tasks along the lane axis).
    shared_all = jnp.dot(ws_ref[...], task_cols_ref[0, 0],
                         preferred_element_type=jnp.float32) + bs_ref[...]
    shared_all = jnp.maximum(shared_all, 0.0).astype(jnp.bfloat16)   # (Fn, T*TP)

    # Trunk half of the first 1x1 attention conv for ALL tasks in ONE matmul (+ bias).
    h_trunk = jnp.dot(w1t_ref[...], trunk_bf,
                      preferred_element_type=jnp.float32) + b1_ref[...]   # (T*Fn, TP)

    for t in range(n_tasks):                                      # static unroll (T is small)
        shared_t = shared_all[:, t * tp:(t + 1) * tp]             # lane slice, offset % 128 == 0
        h = h_trunk[t * fn:(t + 1) * fn] + jnp.dot(               # shared half of 1x1 conv
            w1s_ref[t], shared_t, preferred_element_type=jnp.float32)
        h = jnp.maximum(h, 0.0)
        g = jnp.dot(w2_ref[t], h.astype(jnp.bfloat16),
                    preferred_element_type=jnp.float32) + b2_ref[t]
        # sigmoid = 1 / (1 + exp(-x)); divide goes to the EUP slot via approx reciprocal.
        g = pl.reciprocal(1.0 + jnp.exp(-g), approx=True)
        att_out_ref[t, 0] = (g * trunk).astype(att_out_ref.dtype)  # mask * output_trunk


# ------------------------------ wrapper helpers -------------------------------

def _interp_matrix(out_size, in_size):
    """1-D interpolation matrix matching F.interpolate(mode='bilinear', align_corners=True)."""
    rows = []
    for i in range(out_size):
        src = 0.0 if out_size == 1 else i * (in_size - 1) / (out_size - 1)
        i0 = min(int(src), in_size - 1)
        i1 = min(i0 + 1, in_size - 1)
        frac = src - i0
        row = [0.0] * in_size
        row[i0] += 1.0 - frac
        row[i1] += frac
        rows.append(row)
    return jnp.array(rows, jnp.float32)                    # (out_size, in_size)


def _im2col_3x3_nchw(x):
    """(N, C, H, W) -> (N, 9*C, H*W) columns for a 3x3/pad=1 conv.

    K ordering is (ci, dy*3+dx), matching a PyTorch (Cout, Cin, 3, 3) weight reshaped to
    (Cout, Cin*9)."""
    n, c, h, w = x.shape
    xp = jnp.pad(x, ((0, 0), (0, 0), (1, 1), (1, 1)))
    taps = [xp[:, :, dy:dy + h, dx:dx + w] for dy in range(3) for dx in range(3)]
    cols = jnp.stack(taps, axis=2)                         # (N, C, 9, H, W)
    return cols.reshape(n, c * 9, h * w)


def _fold_conv(w, b, scale, bias):
    """Fold eval-mode BatchNorm into the conv: BN(w@x + b) = (w*s) @ x + (b*s + o)."""
    w2 = w.reshape(w.shape[0], -1) * scale[:, None]
    off = (b * scale + bias)[:, None]                      # (Cout, 1): broadcasts over pixels
    return w2.astype(jnp.bfloat16), off.astype(jnp.float32)


def _pick_pixel_tile(p):
    """Largest lane tile (multiple of 128, <=512) dividing P; prefer >=2 tiles so the pixel grid
    axis is non-degenerate. The 512 cap keeps double-buffered blocks well inside v7x's 64 MiB
    VMEM at realistic channel counts (bigger tiles buy nothing once lane-dense)."""
    fallback = None
    for tp in (512, 256, 128):
        if p % tp == 0:
            if p // tp >= 2:
                return tp
            if fallback is None:
                fallback = tp
    return fallback if fallback is not None else p         # full extent (allowed by BlockSpec)


# --------------------------------- forward ------------------------------------

def attention_block_decoder_forward(params, input_trunk, input_task_specific,
                                    n_tasks, upsampling=True, out_dtype=jnp.float32):
    if len(input_task_specific) != n_tasks:
        raise ValueError("Input from task-specific route not same count as tasks.")

    n, c_in, ho, wo = input_trunk.shape
    fn = params["shared"]["w"].shape[0]                    # filter_next
    p = ho * wo
    tp = _pick_pixel_tile(p)
    n_pt = p // tp

    # ---- BN-folded bf16 weights (MXU operands) + f32 offsets ----
    wt, bt = _fold_conv(params["trunk"]["w"], params["trunk"]["b"],
                        params["trunk"]["scale"], params["trunk"]["bias"])
    ws, bs = _fold_conv(params["shared"]["w"], params["shared"]["b"],
                        params["shared"]["scale"], params["shared"]["bias"])
    w1l, b1l, w2l, b2l = [], [], [], []
    for ap in params["att"]:
        w1e, b1e = _fold_conv(ap["w1"], ap["b1"], ap["s1"], ap["o1"])
        w2e, b2e = _fold_conv(ap["w2"], ap["b2"], ap["s2"], ap["o2"])
        w1l.append(w1e); b1l.append(b1e); w2l.append(w2e); b2l.append(b2e)
    w1_all = jnp.stack(w1l)                                # (T, Fn, 2*Fn) bf16
    b1_all = jnp.stack(b1l)                                # (T, Fn, 1)    f32
    w2 = jnp.stack(w2l)                                    # (T, Fn, Fn)   bf16
    b2 = jnp.stack(b2l)                                    # (T, Fn, 1)    f32
    # Split the first 1x1 attention conv: cat order is (trunk, shared).
    w1t = w1_all[:, :, :fn].reshape(n_tasks * fn, fn)      # trunk halves, stacked on sublanes
    w1s = w1_all[:, :, fn:]                                # shared halves, per task
    b1 = b1_all.reshape(n_tasks * fn, 1)

    # ---- one-time input prep (wrapper XLA ops) ----
    # im2col for the trunk conv; exact align_corners=True bilinear x2 upsample (precomputed
    # interpolation matrix) + im2col for the shared conv on every task input.
    trunk_cols = _im2col_3x3_nchw(input_trunk).astype(jnp.bfloat16)      # (N, 9*Cin, P)

    tasks = jnp.stack(input_task_specific)                 # (T, N, F, Hi, Wi)
    t_, _, f, hi, wi = tasks.shape
    if upsampling:
        k_up = jnp.kron(_interp_matrix(ho, hi), _interp_matrix(wo, wi))  # (P, Hi*Wi)
        up = jnp.einsum('pq,tncq->tncp', k_up, tasks.reshape(t_, n, f, hi * wi))
        up = up.reshape(t_, n, f, ho, wo)
    else:
        if (hi, wi) != (ho, wo):
            raise ValueError("upsampling=False requires task inputs at the trunk resolution.")
        up = tasks
    task_cols = _im2col_3x3_nchw(up.reshape(t_ * n, f, ho, wo))
    task_cols = task_cols.reshape(t_, n, 9 * f, p)                       # (T, N, 9*F, P)
    # Pre-tile the pixel axis and concatenate tasks along the lane axis within each tile so the
    # kernel does ONE shared-conv matmul with lane dim T*TP and takes static 128-aligned slices.
    task_cols = task_cols.reshape(t_, n, 9 * f, n_pt, tp)
    task_cols = jnp.transpose(task_cols, (1, 3, 2, 0, 4))                # (N, n_pt, 9*F, T, TP)
    task_cols = task_cols.reshape(n, n_pt, 9 * f, t_ * tp).astype(jnp.bfloat16)

    trunk_out, att_out = pl.pallas_call(
        _fused_decoder_kernel,
        out_shape=(jax.ShapeDtypeStruct((n, fn, p), out_dtype),
                   jax.ShapeDtypeStruct((t_, n, fn, p), out_dtype)),
        grid_spec=pltpu.PrefetchScalarGridSpec(
            num_scalar_prefetch=0,
            grid=(n, n_pt),                                # (batch, pixel-tile), both parallel
            in_specs=[
                pl.BlockSpec((1, 9 * c_in, tp), lambda i, j: (i, 0, j)),
                pl.BlockSpec((1, 1, 9 * f, t_ * tp), lambda i, j: (i, j, 0, 0)),
                pl.BlockSpec((fn, 9 * c_in), lambda i, j: (0, 0)),
                pl.BlockSpec((fn, 1), lambda i, j: (0, 0)),
                pl.BlockSpec((fn, 9 * f), lambda i, j: (0, 0)),
                pl.BlockSpec((fn, 1), lambda i, j: (0, 0)),
                pl.BlockSpec((t_ * fn, fn), lambda i, j: (0, 0)),
                pl.BlockSpec((t_ * fn, 1), lambda i, j: (0, 0)),
                pl.BlockSpec((t_, fn, fn), lambda i, j: (0, 0, 0)),
                pl.BlockSpec((t_, fn, fn), lambda i, j: (0, 0, 0)),
                pl.BlockSpec((t_, fn, 1), lambda i, j: (0, 0, 0)),
            ],
            out_specs=(pl.BlockSpec((1, fn, tp), lambda i, j: (i, 0, j)),
                       pl.BlockSpec((t_, 1, fn, tp), lambda i, j: (0, i, 0, j))),
        ),
        compiler_params=pltpu.CompilerParams(
            dimension_semantics=("parallel", "parallel")),
    )(trunk_cols, task_cols, wt, bt, ws, bs, w1t, b1, w1s, w2, b2)

    # (N, Fn, P) is already channel-major: reshape straight to NCHW, no transposes.
    output_trunk = trunk_out.reshape(n, fn, ho, wo)
    output_attentions = tuple(att_out[i].reshape(n, fn, ho, wo) for i in range(n_tasks))
    return output_trunk, output_attentions


# --------------------------- pure-JAX f32 reference ----------------------------

def _reference_forward(params, input_trunk, input_task_specific, n_tasks, upsampling=True):
    def bn(y, scale, bias):
        return y * scale[None, :, None, None] + bias[None, :, None, None]

    def conv3x3(x, pr):
        y = jax.lax.conv_general_dilated(
            x, pr["w"], window_strides=(1, 1), padding=((1, 1), (1, 1)),
            dimension_numbers=("NCHW", "OIHW", "NCHW"))
        y = y + pr["b"][None, :, None, None]
        return jnp.maximum(bn(y, pr["scale"], pr["bias"]), 0.0)

    trunk = conv3x3(input_trunk, params["trunk"])
    n, _, ho, wo = trunk.shape
    outs = []
    for t in range(n_tasks):
        x = input_task_specific[t]
        if upsampling:
            _, f, hi, wi = x.shape
            k_up = jnp.kron(_interp_matrix(ho, hi), _interp_matrix(wo, wi))
            x = jnp.einsum("pq,ncq->ncp", k_up, x.reshape(n, f, hi * wi)).reshape(n, f, ho, wo)
        shared = conv3x3(x, params["shared"])
        cat = jnp.concatenate([trunk, shared], axis=1)
        ap = params["att"][t]
        h = jnp.einsum("oc,nchw->nohw", ap["w1"], cat) + ap["b1"][None, :, None, None]
        h = jnp.maximum(bn(h, ap["s1"], ap["o1"]), 0.0)
        g = jnp.einsum("oc,nchw->nohw", ap["w2"], h) + ap["b2"][None, :, None, None]
        g = jax.nn.sigmoid(bn(g, ap["s2"], ap["o2"]))
        outs.append(g * trunk)
    return trunk, tuple(outs)


# ------------------------------ parameter init --------------------------------

def _bn_fold(key, c):
    k1, k2, k3, k4 = jax.random.split(key, 4)
    gamma = 1.0 + 0.1 * jax.random.normal(k1, (c,), jnp.float32)
    beta = 0.05 * jax.random.normal(k2, (c,), jnp.float32)
    mean = 0.05 * jax.random.normal(k3, (c,), jnp.float32)
    var = 1.0 + 0.1 * jax.random.uniform(k4, (c,), jnp.float32)
    scale = gamma * jax.lax.rsqrt(var + 1e-5)
    bias = beta - mean * scale
    return scale, bias


def init_params(key, c_in, filt, filt_next, n_tasks):
    counter = [0]

    def nxt():
        counter[0] += 1
        return jax.random.fold_in(key, counter[0])

    params = {}
    # attented_layer (modeled): Conv3x3(c_in -> filt_next) + BN + ReLU.
    w = 0.1 * jax.random.normal(nxt(), (filt_next, c_in, 3, 3), jnp.float32)
    b = 0.05 * jax.random.normal(nxt(), (filt_next,), jnp.float32)
    s, o = _bn_fold(nxt(), filt_next)
    params["trunk"] = {"w": w, "b": b, "scale": s, "bias": o}
    # shared_feature_extractor: Conv3x3(filt -> filt_next) + BN + ReLU.
    w = 0.1 * jax.random.normal(nxt(), (filt_next, filt, 3, 3), jnp.float32)
    b = 0.05 * jax.random.normal(nxt(), (filt_next,), jnp.float32)
    s, o = _bn_fold(nxt(), filt_next)
    params["shared"] = {"w": w, "b": b, "scale": s, "bias": o}
    # Per-task attention heads: Conv1x1(2*fn -> fn)+BN+ReLU, Conv1x1(fn -> fn)+BN+Sigmoid.
    params["att"] = []
    for _ in range(n_tasks):
        w1 = 0.1 * jax.random.normal(nxt(), (filt_next, 2 * filt_next), jnp.float32)
        b1 = 0.05 * jax.random.normal(nxt(), (filt_next,), jnp.float32)
        s1, o1 = _bn_fold(nxt(), filt_next)
        w2 = 0.1 * jax.random.normal(nxt(), (filt_next, filt_next), jnp.float32)
        b2 = 0.05 * jax.random.normal(nxt(), (filt_next,), jnp.float32)
        s2, o2 = _bn_fold(nxt(), filt_next)
        params["att"].append({"w1": w1, "b1": b1, "s1": s1, "o1": o1,
                              "w2": w2, "b2": b2, "s2": s2, "o2": o2})
    return params


# ----------------------------------- main --------------------------------------

if __name__ == "__main__":
    N, C_IN = 2, 4
    FILTER, FILTER_NEXT, N_TASKS = 8, 16, 2
    HI = WI = 8                        # task-specific (decoder input) resolution
    HO, WO = 2 * HI, 2 * WI            # output resolution (bilinear x2 upsampling)

    key = jax.random.PRNGKey(0)
    k_p, k_x, k_t = jax.random.split(key, 3)
    params = init_params(k_p, C_IN, FILTER, FILTER_NEXT, N_TASKS)

    input_trunk = jax.random.normal(k_x, (N, C_IN, HO, WO), jnp.float32)            # NCHW
    task_keys = jax.random.split(k_t, N_TASKS)
    input_task_specific = [jax.random.normal(tk, (N, FILTER, HI, WI), jnp.float32)
                           for tk in task_keys]                                      # NCHW

    output_trunk, output_attentions = attention_block_decoder_forward(
        params, input_trunk, input_task_specific, N_TASKS, upsampling=True)

    jax.block_until_ready(output_trunk)
    for o in output_attentions:
        jax.block_until_ready(o)

    assert output_trunk.shape == (N, FILTER_NEXT, HO, WO)
    assert len(output_attentions) == N_TASKS
    for o in output_attentions:
        assert o.shape == (N, FILTER_NEXT, HO, WO)

    # Tolerance check against a pure-JAX f32 reference (loose tol: bf16 MXU operands + approx
    # reciprocal in the sigmoid; a layout/index bug would show up as O(1) error).
    ref_trunk, ref_atts = _reference_forward(params, input_trunk, input_task_specific,
                                             N_TASKS, upsampling=True)
    max_err = float(jnp.max(jnp.abs(output_trunk - ref_trunk)))
    for o, r in zip(output_attentions, ref_atts):
        max_err = max(max_err, float(jnp.max(jnp.abs(o - r))))
    assert max_err < 0.15, f"kernel deviates from f32 reference: max abs err {max_err}"

    print("KERNEL_OK")
</pallas_src>

<mosaic_0001>
module attributes {stable_mosaic.version = 11 : i64} {
  func.func @_fused_decoder_kernel(%arg0: i32, %arg1: i32, %arg2: memref<1x36x128xbf16, #tpu.memory_space<vmem>>, %arg3: memref<1x1x72x256xbf16, #tpu.memory_space<vmem>>, %arg4: memref<16x36xbf16, #tpu.memory_space<vmem>>, %arg5: memref<16x1xf32, #tpu.memory_space<vmem>>, %arg6: memref<16x72xbf16, #tpu.memory_space<vmem>>, %arg7: memref<16x1xf32, #tpu.memory_space<vmem>>, %arg8: memref<32x16xbf16, #tpu.memory_space<vmem>>, %arg9: memref<32x1xf32, #tpu.memory_space<vmem>>, %arg10: memref<2x16x16xbf16, #tpu.memory_space<vmem>>, %arg11: memref<2x16x16xbf16, #tpu.memory_space<vmem>>, %arg12: memref<2x16x1xf32, #tpu.memory_space<vmem>>, %arg13: memref<1x16x128xf32, #tpu.memory_space<vmem>>, %arg14: memref<2x1x16x128xf32, #tpu.memory_space<vmem>>) attributes {dimension_semantics = [#tpu.dimension_semantics<parallel>, #tpu.dimension_semantics<parallel>], iteration_bounds = array<i64: 2, 2>, scalar_prefetch = 0 : i64, scratch_operands = 0 : i64, tpu.core_type = #tpu.core_type<tc>, window_params = [{transform_indices = @transform_0, window_bounds = array<i64: 1, 36, 128>}, {transform_indices = @transform_1, window_bounds = array<i64: 1, 1, 72, 256>}, {pipeline_mode = #tpu.pipeline_mode<synchronous>, transform_indices = @transform_2, window_bounds = array<i64: 16, 36>}, {pipeline_mode = #tpu.pipeline_mode<synchronous>, transform_indices = @transform_3, window_bounds = array<i64: 16, 1>}, {pipeline_mode = #tpu.pipeline_mode<synchronous>, transform_indices = @transform_4, window_bounds = array<i64: 16, 72>}, {pipeline_mode = #tpu.pipeline_mode<synchronous>, transform_indices = @transform_5, window_bounds = array<i64: 16, 1>}, {pipeline_mode = #tpu.pipeline_mode<synchronous>, transform_indices = @transform_6, window_bounds = array<i64: 32, 16>}, {pipeline_mode = #tpu.pipeline_mode<synchronous>, transform_indices = @transform_7, window_bounds = array<i64: 32, 1>}, {pipeline_mode = #tpu.pipeline_mode<synchronous>, transform_indices = @transform_8, window_bounds = array<i64: 2, 16, 16>}, {pipeline_mode = #tpu.pipeline_mode<synchronous>, transform_indices = @transform_9, window_bounds = array<i64: 2, 16, 16>}, {pipeline_mode = #tpu.pipeline_mode<synchronous>, transform_indices = @transform_10, window_bounds = array<i64: 2, 16, 1>}, {transform_indices = @transform_11, window_bounds = array<i64: 1, 16, 128>}, {transform_indices = @transform_12, window_bounds = array<i64: 2, 1, 16, 128>}]} {
    %c0 = arith.constant 0 : index
    %c0_0 = arith.constant 0 : index
    %0 = vector.load %arg4[%c0, %c0_0] : memref<16x36xbf16, #tpu.memory_space<vmem>>, vector<16x36xbf16>
    %c0_1 = arith.constant 0 : index
    %c0_2 = arith.constant 0 : index
    %c0_3 = arith.constant 0 : index
    %1 = vector.load %arg2[%c0_1, %c0_2, %c0_3] : memref<1x36x128xbf16, #tpu.memory_space<vmem>>, vector<1x36x128xbf16>
    %2 = vector.shape_cast %1 : vector<1x36x128xbf16> to vector<36x128xbf16>
    %cst = arith.constant dense<0.000000e+00> : vector<16x128xf32>
    %3 = tpu.matmul %0, %2, %cst {dimension_numbers = #tpu.dot_dimension_numbers<[1], [0], [0], [1], [0, 0, 1, 1], [], []>} : vector<16x36xbf16>, vector<36x128xbf16>, vector<16x128xf32> -> vector<16x128xf32>
    %c0_4 = arith.constant 0 : index
    %c0_5 = arith.constant 0 : index
    %4 = vector.load %arg5[%c0_4, %c0_5] : memref<16x1xf32, #tpu.memory_space<vmem>>, vector<16x1xf32>
    %5 = vector.broadcast %4 : vector<16x1xf32> to vector<16x128xf32>
    %6 = arith.addf %3, %5 : vector<16x128xf32>
    %cst_6 = arith.constant 0.000000e+00 : f32
    %7 = vector.broadcast %cst_6 : f32 to vector<16x128xf32>
    %8 = arith.maximumf %6, %7 : vector<16x128xf32>
    %c0_7 = arith.constant 0 : index
    %c0_8 = arith.constant 0 : index
    %c0_9 = arith.constant 0 : index
    %9 = vector.load %arg13[%c0_7, %c0_8, %c0_9] : memref<1x16x128xf32, #tpu.memory_space<vmem>>, vector<1x16x128xf32>
    %10 = vector.shape_cast %9 : vector<1x16x128xf32> to vector<16x128xf32>
    %11 = vector.shape_cast %8 : vector<16x128xf32> to vector<1x16x128xf32>
    tpu.vector_store %arg13[%c0_7, %c0_8, %c0_9], %11 {strides = array<i32>} : memref<1x16x128xf32, #tpu.memory_space<vmem>>, vector<1x16x128xf32>,
    %12 = arith.truncf %8 : vector<16x128xf32> to vector<16x128xbf16>
    %c0_10 = arith.constant 0 : index
    %c0_11 = arith.constant 0 : index
    %13 = vector.load %arg6[%c0_10, %c0_11] : memref<16x72xbf16, #tpu.memory_space<vmem>>, vector<16x72xbf16>
    %c0_12 = arith.constant 0 : index
    %c0_13 = arith.constant 0 : index
    %c0_14 = arith.constant 0 : index
    %c0_15 = arith.constant 0 : index
    %14 = vector.load %arg3[%c0_12, %c0_13, %c0_14, %c0_15] : memref<1x1x72x256xbf16, #tpu.memory_space<vmem>>, vector<1x1x72x256xbf16>
    %15 = vector.shape_cast %14 : vector<1x1x72x256xbf16> to vector<72x256xbf16>
    %cst_16 = arith.constant dense<0.000000e+00> : vector<16x256xf32>
    %16 = tpu.matmul %13, %15, %cst_16 {dimension_numbers = #tpu.dot_dimension_numbers<[1], [0], [0], [1], [0, 0, 1, 1], [], []>} : vector<16x72xbf16>, vector<72x256xbf16>, vector<16x256xf32> -> vector<16x256xf32>
    %c0_17 = arith.constant 0 : index
    %c0_18 = arith.constant 0 : index
    %17 = vector.load %arg7[%c0_17, %c0_18] : memref<16x1xf32, #tpu.memory_space<vmem>>, vector<16x1xf32>
    %18 = vector.broadcast %17 : vector<16x1xf32> to vector<16x256xf32>
    %19 = arith.addf %16, %18 : vector<16x256xf32>
    %cst_19 = arith.constant 0.000000e+00 : f32
    %20 = vector.broadcast %cst_19 : f32 to vector<16x256xf32>
    %21 = arith.maximumf %19, %20 : vector<16x256xf32>
    %22 = arith.truncf %21 : vector<16x256xf32> to vector<16x256xbf16>
    %c0_20 = arith.constant 0 : index
    %c0_21 = arith.constant 0 : index
    %23 = vector.load %arg8[%c0_20, %c0_21] : memref<32x16xbf16, #tpu.memory_space<vmem>>, vector<32x16xbf16>
    %cst_22 = arith.constant dense<0.000000e+00> : vector<32x128xf32>
    %24 = tpu.matmul %23, %12, %cst_22 {dimension_numbers = #tpu.dot_dimension_numbers<[1], [0], [0], [1], [0, 0, 1, 1], [], []>} : vector<32x16xbf16>, vector<16x128xbf16>, vector<32x128xf32> -> vector<32x128xf32>
    %c0_23 = arith.constant 0 : index
    %c0_24 = arith.constant 0 : index
    %25 = vector.load %arg9[%c0_23, %c0_24] : memref<32x1xf32, #tpu.memory_space<vmem>>, vector<32x1xf32>
    %26 = vector.broadcast %25 : vector<32x1xf32> to vector<32x128xf32>
    %27 = arith.addf %24, %26 : vector<32x128xf32>
    %28 = vector.extract_strided_slice %22 {offsets = [0, 0], sizes = [16, 128], strides = [1, 1]} : vector<16x256xbf16> to vector<16x128xbf16>
    %29 = vector.extract_strided_slice %27 {offsets = [0, 0], sizes = [16, 128], strides = [1, 1]} : vector<32x128xf32> to vector<16x128xf32>
    %c0_25 = arith.constant 0 : index
    %c0_26 = arith.constant 0 : index
    %c0_27 = arith.constant 0 : index
    %30 = vector.load %arg10[%c0_25, %c0_26, %c0_27] : memref<2x16x16xbf16, #tpu.memory_space<vmem>>, vector<1x16x16xbf16>
    %31 = vector.shape_cast %30 : vector<1x16x16xbf16> to vector<16x16xbf16>
    %cst_28 = arith.constant dense<0.000000e+00> : vector<16x128xf32>
    %32 = tpu.matmul %31, %28, %cst_28 {dimension_numbers = #tpu.dot_dimension_numbers<[1], [0], [0], [1], [0, 0, 1, 1], [], []>} : vector<16x16xbf16>, vector<16x128xbf16>, vector<16x128xf32> -> vector<16x128xf32>
    %33 = arith.addf %29, %32 : vector<16x128xf32>
    %cst_29 = arith.constant 0.000000e+00 : f32
    %34 = vector.broadcast %cst_29 : f32 to vector<16x128xf32>
    %35 = arith.maximumf %33, %34 : vector<16x128xf32>
    %c0_30 = arith.constant 0 : index
    %c0_31 = arith.constant 0 : index
    %c0_32 = arith.constant 0 : index
    %36 = vector.load %arg11[%c0_30, %c0_31, %c0_32] : memref<2x16x16xbf16, #tpu.memory_space<vmem>>, vector<1x16x16xbf16>
    %37 = vector.shape_cast %36 : vector<1x16x16xbf16> to vector<16x16xbf16>
    %38 = arith.truncf %35 : vector<16x128xf32> to vector<16x128xbf16>
    %cst_33 = arith.constant dense<0.000000e+00> : vector<16x128xf32>
    %39 = tpu.matmul %37, %38, %cst_33 {dimension_numbers = #tpu.dot_dimension_numbers<[1], [0], [0], [1], [0, 0, 1, 1], [], []>} : vector<16x16xbf16>, vector<16x128xbf16>, vector<16x128xf32> -> vector<16x128xf32>
    %c0_34 = arith.constant 0 : index
    %c0_35 = arith.constant 0 : index
    %c0_36 = arith.constant 0 : index
    %40 = vector.load %arg12[%c0_34, %c0_35, %c0_36] : memref<2x16x1xf32, #tpu.memory_space<vmem>>, vector<1x16x1xf32>
    %41 = vector.shape_cast %40 : vector<1x16x1xf32> to vector<16x1xf32>
    %42 = vector.broadcast %41 : vector<16x1xf32> to vector<16x128xf32>
    %43 = arith.addf %39, %42 : vector<16x128xf32>
    %cst_37 = arith.constant 0.000000e+00 : f32
    %44 = vector.broadcast %cst_37 : f32 to vector<16x128xf32>
    %45 = arith.subf %44, %43 : vector<16x128xf32>
    %46 = math.exp %45 : vector<16x128xf32>
    %cst_38 = arith.constant 1.000000e+00 : f32
    %47 = vector.broadcast %cst_38 : f32 to vector<16x128xf32>
    %48 = arith.addf %47, %46 : vector<16x128xf32>
    %49 = tpu.reciprocal %48 {approx = true} : vector<16x128xf32> -> vector<16x128xf32>
    %50 = arith.mulf %49, %8 : vector<16x128xf32>
    %c0_39 = arith.constant 0 : index
    %c0_40 = arith.constant 0 : index
    %c0_41 = arith.constant 0 : index
    %c0_42 = arith.constant 0 : index
    %51 = vector.load %arg14[%c0_39, %c0_40, %c0_41, %c0_42] : memref<2x1x16x128xf32, #tpu.memory_space<vmem>>, vector<1x1x16x128xf32>
    %52 = vector.shape_cast %51 : vector<1x1x16x128xf32> to vector<16x128xf32>
    %53 = vector.shape_cast %50 : vector<16x128xf32> to vector<1x1x16x128xf32>
    tpu.vector_store %arg14[%c0_39, %c0_40, %c0_41, %c0_42], %53 {strides = array<i32>} : memref<2x1x16x128xf32, #tpu.memory_space<vmem>>, vector<1x1x16x128xf32>,
    %54 = vector.extract_strided_slice %22 {offsets = [0, 128], sizes = [16, 128], strides = [1, 1]} : vector<16x256xbf16> to vector<16x128xbf16>
    %55 = vector.extract_strided_slice %27 {offsets = [16, 0], sizes = [16, 128], strides = [1, 1]} : vector<32x128xf32> to vector<16x128xf32>
    %c1 = arith.constant 1 : index
    %c0_43 = arith.constant 0 : index
    %c0_44 = arith.constant 0 : index
    %56 = vector.load %arg10[%c1, %c0_43, %c0_44] : memref<2x16x16xbf16, #tpu.memory_space<vmem>>, vector<1x16x16xbf16>
    %57 = vector.shape_cast %56 : vector<1x16x16xbf16> to vector<16x16xbf16>
    %cst_45 = arith.constant dense<0.000000e+00> : vector<16x128xf32>
    %58 = tpu.matmul %57, %54, %cst_45 {dimension_numbers = #tpu.dot_dimension_numbers<[1], [0], [0], [1], [0, 0, 1, 1], [], []>} : vector<16x16xbf16>, vector<16x128xbf16>, vector<16x128xf32> -> vector<16x128xf32>
    %59 = arith.addf %55, %58 : vector<16x128xf32>
    %cst_46 = arith.constant 0.000000e+00 : f32
    %60 = vector.broadcast %cst_46 : f32 to vector<16x128xf32>
    %61 = arith.maximumf %59, %60 : vector<16x128xf32>
    %c1_47 = arith.constant 1 : index
    %c0_48 = arith.constant 0 : index
    %c0_49 = arith.constant 0 : index
    %62 = vector.load %arg11[%c1_47, %c0_48, %c0_49] : memref<2x16x16xbf16, #tpu.memory_space<vmem>>, vector<1x16x16xbf16>
    %63 = vector.shape_cast %62 : vector<1x16x16xbf16> to vector<16x16xbf16>
    %64 = arith.truncf %61 : vector<16x128xf32> to vector<16x128xbf16>
    %cst_50 = arith.constant dense<0.000000e+00> : vector<16x128xf32>
    %65 = tpu.matmul %63, %64, %cst_50 {dimension_numbers = #tpu.dot_dimension_numbers<[1], [0], [0], [1], [0, 0, 1, 1], [], []>} : vector<16x16xbf16>, vector<16x128xbf16>, vector<16x128xf32> -> vector<16x128xf32>
    %c1_51 = arith.constant 1 : index
    %c0_52 = arith.constant 0 : index
    %c0_53 = arith.constant 0 : index
    %66 = vector.load %arg12[%c1_51, %c0_52, %c0_53] : memref<2x16x1xf32, #tpu.memory_space<vmem>>, vector<1x16x1xf32>
    %67 = vector.shape_cast %66 : vector<1x16x1xf32> to vector<16x1xf32>
    %68 = vector.broadcast %67 : vector<16x1xf32> to vector<16x128xf32>
    %69 = arith.addf %65, %68 : vector<16x128xf32>
    %cst_54 = arith.constant 0.000000e+00 : f32
    %70 = vector.broadcast %cst_54 : f32 to vector<16x128xf32>
    %71 = arith.subf %70, %69 : vector<16x128xf32>
    %72 = math.exp %71 : vector<16x128xf32>
    %cst_55 = arith.constant 1.000000e+00 : f32
    %73 = vector.broadcast %cst_55 : f32 to vector<16x128xf32>
    %74 = arith.addf %73, %72 : vector<16x128xf32>
    %75 = tpu.reciprocal %74 {approx = true} : vector<16x128xf32> -> vector<16x128xf32>
    %76 = arith.mulf %75, %8 : vector<16x128xf32>
    %c1_56 = arith.constant 1 : index
    %c0_57 = arith.constant 0 : index
    %c0_58 = arith.constant 0 : index
    %c0_59 = arith.constant 0 : index
    %77 = vector.load %arg14[%c1_56, %c0_57, %c0_58, %c0_59] : memref<2x1x16x128xf32, #tpu.memory_space<vmem>>, vector<1x1x16x128xf32>
    %78 = vector.shape_cast %77 : vector<1x1x16x128xf32> to vector<16x128xf32>
    %79 = vector.shape_cast %76 : vector<16x128xf32> to vector<1x1x16x128xf32>
    tpu.vector_store %arg14[%c1_56, %c0_57, %c0_58, %c0_59], %79 {strides = array<i32>} : memref<2x1x16x128xf32, #tpu.memory_space<vmem>>, vector<1x1x16x128xf32>,
    return
  }
  func.func @transform_0(%arg0: i32, %arg1: i32) -> (i32, i32, i32) {
    %c0_i32 = arith.constant 0 : i32
    %c0_i32_0 = arith.constant 0 : i32
    return %arg0, %c0_i32, %arg1 : i32, i32, i32
  }
  func.func @transform_1(%arg0: i32, %arg1: i32) -> (i32, i32, i32, i32) {
    %c0_i32 = arith.constant 0 : i32
    %c0_i32_0 = arith.constant 0 : i32
    %c0_i32_1 = arith.constant 0 : i32
    return %arg0, %arg1, %c0_i32, %c0_i32_0 : i32, i32, i32, i32
  }
  func.func @transform_2(%arg0: i32, %arg1: i32) -> (i32, i32) {
    %c0_i32 = arith.constant 0 : i32
    %c0_i32_0 = arith.constant 0 : i32
    %c0_i32_1 = arith.constant 0 : i32
    return %c0_i32, %c0_i32_0 : i32, i32
  }
  func.func @transform_3(%arg0: i32, %arg1: i32) -> (i32, i32) {
    %c0_i32 = arith.constant 0 : i32
    %c0_i32_0 = arith.constant 0 : i32
    %c0_i32_1 = arith.constant 0 : i32
    return %c0_i32, %c0_i32_0 : i32, i32
  }
  func.func @transform_4(%arg0: i32, %arg1: i32) -> (i32, i32) {
    %c0_i32 = arith.constant 0 : i32
    %c0_i32_0 = arith.constant 0 : i32
    %c0_i32_1 = arith.constant 0 : i32
    return %c0_i32, %c0_i32_0 : i32, i32
  }
  func.func @transform_5(%arg0: i32, %arg1: i32) -> (i32, i32) {
    %c0_i32 = arith.constant 0 : i32
    %c0_i32_0 = arith.constant 0 : i32
    %c0_i32_1 = arith.constant 0 : i32
    return %c0_i32, %c0_i32_0 : i32, i32
  }
  func.func @transform_6(%arg0: i32, %arg1: i32) -> (i32, i32) {
    %c0_i32 = arith.constant 0 : i32
    %c0_i32_0 = arith.constant 0 : i32
    %c0_i32_1 = arith.constant 0 : i32
    return %c0_i32, %c0_i32_0 : i32, i32
  }
  func.func @transform_7(%arg0: i32, %arg1: i32) -> (i32, i32) {
    %c0_i32 = arith.constant 0 : i32
    %c0_i32_0 = arith.constant 0 : i32
    %c0_i32_1 = arith.constant 0 : i32
    return %c0_i32, %c0_i32_0 : i32, i32
  }
  func.func @transform_8(%arg0: i32, %arg1: i32) -> (i32, i32, i32) {
    %c0_i32 = arith.constant 0 : i32
    %c0_i32_0 = arith.constant 0 : i32
    %c0_i32_1 = arith.constant 0 : i32
    %c0_i32_2 = arith.constant 0 : i32
    return %c0_i32, %c0_i32_0, %c0_i32_1 : i32, i32, i32
  }
  func.func @transform_9(%arg0: i32, %arg1: i32) -> (i32, i32, i32) {
    %c0_i32 = arith.constant 0 : i32
    %c0_i32_0 = arith.constant 0 : i32
    %c0_i32_1 = arith.constant 0 : i32
    %c0_i32_2 = arith.constant 0 : i32
    return %c0_i32, %c0_i32_0, %c0_i32_1 : i32, i32, i32
  }
  func.func @transform_10(%arg0: i32, %arg1: i32) -> (i32, i32, i32) {
    %c0_i32 = arith.constant 0 : i32
    %c0_i32_0 = arith.constant 0 : i32
    %c0_i32_1 = arith.constant 0 : i32
    %c0_i32_2 = arith.constant 0 : i32
    return %c0_i32, %c0_i32_0, %c0_i32_1 : i32, i32, i32
  }
  func.func @transform_11(%arg0: i32, %arg1: i32) -> (i32, i32, i32) {
    %c0_i32 = arith.constant 0 : i32
    %c0_i32_0 = arith.constant 0 : i32
    return %arg0, %c0_i32, %arg1 : i32, i32, i32
  }
  func.func @transform_12(%arg0: i32, %arg1: i32) -> (i32, i32, i32, i32) {
    %c0_i32 = arith.constant 0 : i32
    %c0_i32_0 = arith.constant 0 : i32
    %c0_i32_1 = arith.constant 0 : i32
    return %c0_i32, %arg0, %c0_i32_0, %arg1 : i32, i32, i32, i32
  }
}

</mosaic_0001>

<bundles_post_ra>
// kernel: tpu_custom_call.1
= control target key start
LH: loop header
LB: loop body
LE: loop exit
PB: predicated region body
PF: predicated region fallthrough
CT: control target
= control target key end

     0   :  { %s2151_s0 = inlined_call_operand.vmem [shape: bf16[2,36,256], index: 0, kind: input, shape index: {}]   ;;  %s2152_s1 = inlined_call_operand.hbm [shape: bf16[2,2,72,256], index: 1, kind: input, shape index: {}]   ;;  %s2153_s2 = inlined_call_operand.vmem [shape: bf16[16,36], index: 2, kind: input, shape index: {}]   ;;  %s2154_s3 = inlined_call_operand.vmem [shape: f32[16,1], index: 3, kind: input, shape index: {}]   ;;  %s2155_s4 = inlined_call_operand.vmem [shape: bf16[16,72], index: 4, kind: input, shape index: {}]   ;;  %s2156_s5 = inlined_call_operand.vmem [shape: f32[16,1], index: 5, kind: input, shape index: {}]   ;;  %s2157_s6 = inlined_call_operand.vmem [shape: bf16[32,16], index: 6, kind: input, shape index: {}]   ;;  %s2158_s7 = inlined_call_operand.vmem [shape: f32[32,1], index: 7, kind: input, shape index: {}]   ;;  %s2159_s8 = inlined_call_operand.vmem [shape: bf16[2,16,16], index: 8, kind: input, shape index: {}]   ;;  %s2160_s9 = inlined_call_operand.vmem [shape: bf16[2,16,16], index: 9, kind: input, shape index: {}]   ;;  %s2161_s10 = inlined_call_operand.vmem [shape: f32[2,16,1], index: 10, kind: input, shape index: {}]   ;;  %s2162_s11 = inlined_call_operand.hbm [shape: f32[2,16,256], index: 11, kind: output, shape index: {0}]   ;;  %s2163_s12 = inlined_call_operand.hbm [shape: f32[2,2,16,256], index: 12, kind: output, shape index: {1}]  }
   0x1   :  { %2173 = sst [smem:[#allocation21_spill]] %s2151_s0 }
   0x2   :  { %2174 = sst [smem:[#allocation22_spill]] %s2162_s11 }
   0x3   :  { %2175 = sst [smem:[#allocation23_spill]] %s2163_s12 }
   0x4   :  { %18 = vsyncpa [#allocation4], 0 }
   0x5   :  { %20 = vsyncpa [#allocation4 + $0x1], 0 }
   0x6   :  { %21 = vsyncpa [#allocation5], 0 }
   0x7   :  { %23 = vsyncpa [#allocation5 + $0x1], 0 }
   0x8   :  { %24 = vsyncpa [#allocation8], 0 }
   0x9   :  { %26 = vsyncpa [#allocation8 + $0x1], 0  ;;  %s1817_s21 = smov 0   ;;  %s1819_s22 = smov 0  }
   0xa   :  { %s1821_s23 = smov 0   ;;  %s1823_s24 = smov 0  }
   0xb   :  { %s1825_s25 = smov 0   ;;  %s1827_s26 = smov 0  }
   0xc   :  { %s1829_s27 = smov 0   ;;  %s1831_s28 = smov 0  }
   0xd LB: > { %2176 = sst [smem:[#allocation14_spill]] %s1705_s21  ;;  %s1344_s29 = sadd.s32 4294967295, %s1733_s28   ;;  %s1733_s28 = sphi %s1831_s28, %s32_s28   ;;  %s1729_s27 = sphi %s1829_s27, %s2203_s27   ;;  %s1725_s26 = sphi %s1827_s26, %s2197_s26   ;;  %s1721_s25 = sphi %s1825_s25, %s2202_s25   ;;  %s1717_s24 = sphi %s1823_s24, %s2196_s24   ;;  %s1713_s23 = sphi %s1821_s23, %s2201_s23   ;;  %s1709_s22 = sphi %s1819_s22, %s2200_s22   ;;  %s1705_s21 = sphi %s1817_s21, %s2199_s21  }
   0xe   : > { %2177 = sst [smem:[#allocation15_spill]] %s1725_s26  ;;  %s1345_s30 = sadd.s32 4294967294, %s1733_s28  }
   0xf   : > { %s41_s13 = sadd.s32 1, %s1725_s26  ;;  %s44_s14 = sadd.s32 1, %s1729_s27 }
  0x10   : > { %p42_p0 = scmp.ge.s32.totalorder %s41_s13, 2  ;;  %p60_p1 = scmp.ne.s32.totalorder %s1713_s23, %s1709_s22 }
  0x11   : > { %p61_p2 = scmp.eq.s32.totalorder %s1733_s28, 0  ;;  %p94_p5 = scmp.ne.s32.totalorder %s1709_s22, %s1705_s21 }
  0x12   : > { %s2205_s13 = smov (%p42_p0, %s41_s13), 0  ;;  %s2207_s14 = smov (!%p42_p0, %s44_s14), %s1729_s27 }
  0x13   : > { %2178 = sst [smem:[#allocation16_spill]] %s2205_s13  ;;  %s49_s15 = ssub.s32 %s1725_s26, %s2205_s13 }
  0x14   : > { %p1869_p3 = por %p61_p2, %p60_p1  ;;  %p46_p4 = scmp.ge.s32.totalorder %s2207_s14, 2 }
  0x15   : > { %p95_p6 = scmp.eq.s32.totalorder %s1344_s29, 0  ;;  %p309_p7 = scmp.eq.s32.totalorder %s1344_s29, 3 }
  0x16   : > { %s2209_s14 = smov (%p46_p4, %s2207_s14), 0  ;;  %p315_p10 = scmp.eq.s32.totalorder %s1345_s30, 3 }
  0x17   : > { %2180 = sst [smem:[#allocation17_spill]] %s2209_s14  ;;  %p1877_p8 = por %p95_p6, %p94_p5 }
  0x18   : > { %p1881_p9 = por %p309_p7, %p60_p1  ;;  %s48_s19 = ssub.s32 %s1729_s27, %s2209_s14 }
  0x19   : > { %s50_s20 = sor.u32 %s49_s15, %s48_s19  ;;  %s53_s13 = sadd.s32 1, %s1713_s23 }
  0x1a   : > { %s2182_s18 = scalar_select %p1881_p9, 1, 0 }
  0x1b   : > { %p51_p11 = scmp.eq.s32.totalorder %s50_s20, 0  ;;  %p1888_p12 = por %p315_p10, %p94_p5 }
  0x1c   : > { %2183 = sst [smem:[#allocation18_spill]] %s2182_s18  ;;  %p1347_p13 = scmp.ge.s32.totalorder %s1733_s28, 4 }
  0x1d   : > { %s2184_s21 = scalar_select %p1888_p12, 1, 0 }
  0x1e   : > { %s1893_s29 = scalar_select %p51_p11, %s1713_s23, %s53_s13  }
  0x1f   : > { %2185 = sst [smem:[#allocation19_spill]] %s2184_s21  ;;  %386 = sbr.rel (%p1347_p13) target bundleno = 79 (0x4f), region = 52 }
  0x20   : > { %2186 = sst [smem:[#allocation20_spill]] %s1893_s29 }
  0x26   : > { %389 = sbr.rel (!%p1869_p3) target bundleno = 50 (0x32), region = 56  ;;  %s391_s14 = sand.u32 (%p1869_p3), 1, %s1713_s23  }
  0x27   : > { %s1455_s30 = smul.u32 (%p1869_p3), 10, %s1729_s27  ;;  %s2187_s0 = sld [smem:[#allocation21_spill]] (%p1869_p3) }
  0x28   : > { %s1454_s15 = smul.u32 (%p1869_p3), 20, %s391_s14 }
  0x29   : > { %s395_s19 = sadd.s32 (%p1869_p3), %s1725_s26, %s1455_s30 }
  0x2a   : > { %s1348_s20 = sshll.u32 (%p1869_p3), %s395_s19, 2  ;;  %s393_s13 = scalar_lea.vmem (%p1869_p3), [#allocation2], %s1454_s15 }
  0x2d   : > { %s397_s21 = scalar_lea.vmem %s2187_s0, %s1348_s20 }
  0x2e   : > { %v413_v0 = vld [vmem:[%s397_s21] sm:$0xf]  ;;  %v415_v1 = vld [vmem:[%s397_s21 + $0x8] sm:$0xf]  ;;  %v417_v2 = vld [vmem:[%s397_s21 + $0x10] sm:$0xf] }
  0x2f   : > { %414 = vst [vmem:[%s393_s13] sm:$0xf] %v413_v0  ;;  %416 = vst [vmem:[%s393_s13 + $0x4] sm:$0xf] %v415_v1  ;;  %v419_v3 = vld [vmem:[%s397_s21 + $0x18] sm:$0xf] }
  0x30   : > { %418 = vst [vmem:[%s393_s13 + $0x8] sm:$0xf] %v417_v2  ;;  %v421_v4 = vld [vmem:[%s397_s21 + $0x20] sm:$0xf]  ;;  %420 = vst [vmem:[%s393_s13 + $0xc] sm:$0xf] %v419_v3 }
  0x31   : > { %422 = vst [vmem:[%s393_s13 + $0x10] sm:$0xf] %v421_v4 }
  0x32 PF: > { %s456_s14 = sand.u32 1, %s1713_s23   ;;  %s1457_s30 = smul.u32 18, %s1725_s26 }
  0x33   : > { %s1456_s11 = smul.u32 72, %s456_s14  ;;  %s1914_s13 = scalar_lea.sflag [#allocation4], %s456_s14 }
  0x34   : > { %s1458_s12 = smul.u32 36, %s1729_s27 }
  0x35   : > { %s460_s20 = scalar_lea.vmem [#allocation3], %s1456_s11 }
  0x36   : > { %s466_s19 = sadd.s32 %s1458_s12, %s1457_s30  ;;  %s469_s0 = sshll.u32 %s460_s20, 4  ;;  %s1907_s0 = int_to_ptr.vmem [resolvable:$true] %s469_s0 }
  0x37   : > { %s1349_s15 = sshll.u32 %s466_s19, 6  ;;  %s1607_s12 = scalar_lea.hbm %s2152_s1, 4608 }
  0x38   : > { %s1912_s21 = scalar_lea.hbm %s2152_s1, %s1349_s15 }
  0x39   : > { %s1603_s26 = scalar_lea.hbm %s1912_s21, 1152  ;;  %p1608_p4 = scmp.lt.u32.totalorder %s1912_s21, %s2152_s1 }
  0x3a   : > { %p1604_p0 = scmp.ne.s32.totalorder %s1912_s21, %s1603_s26  ;;  %p1609_p5 = scmp.lt.u32.totalorder %s1607_s12, %s1603_s26 }
  0x3b   : > { %p1611_p7 = scmp.lt.u32.totalorder %s1603_s26, %s1912_s21 }
  0x3c   : > { %p1605_p1 = pnand %p1604_p0, %p1869_p3  ;;  %p1610_p6 = por %p1609_p5, %p1608_p4 }
  0x3e   : > { %p1606_p2 = pneg %p1605_p1  ;;  %p1612_p10 = por %p1611_p7, %p1610_p6 }
  0x40   : > { %p1613_p11 = pnand %p1612_p10, %p1606_p2 }
  0x42   : > { %1616 = shalt.err (!%p1613_p11)
}
  0x43   : > { %s1617_s18 = scalar_lea.vmem %s1907_s0, 1152  ;;  %s1735_s29 = smov [#allocation3]  }
  0x44   : > { %p1618_p13 = scmp.ne.s32.totalorder %s1907_s0, %s1617_s18  ;;  %s1621_s14 = sshll.u32 %s1735_s29, 4  ;;  %s1622_s14 = int_to_ptr.vmem [resolvable:$false] %s1621_s14 }
  0x45   : > { %s1623_s15 = scalar_lea.vmem %s1622_s14, 2304  ;;  %p1624_p12 = scmp.lt.s32.totalorder %s1907_s0, %s1622_s14 }
  0x46   : > { %p1619_p0 = pnand %p1618_p13, %p1869_p3  ;;  %p1625_p9 = scmp.lt.s32.totalorder %s1623_s15, %s1617_s18 }
  0x48   : > { %p1620_p1 = pneg %p1619_p0  ;;  %p1626_p4 = por %p1625_p9, %p1624_p12 }
  0x4a   : > { %p1627_p5 = pnand %p1626_p4, %p1620_p1 }
  0x4c   : > { %1630 = shalt.err (!%p1627_p5)
}
  0x4d   : > { %s1736_s26 = smov 128   ;;  %s1737_s30 = smov 8  }
  0x4e   : > { %1461 = dma.hbm_to_vmem [thread:$0]  (%p1869_p3), %s1912_s21, 1152, %s1907_s0, %s1914_s13, %s1736_s26, %s1736_s26, %s1737_s30  }
  0x4f PF: > { %p1350_p2 = scmp.ge.s32.totalorder %s1733_s28, 1  ;;  %p477_p6 = scmp.lt.s32.totalorder %s1733_s28, 5 }
  0x51   : > { %p478_p7 = pnand %p1350_p2, %p477_p6 }
  0x52   : > { %s1941_s11 = sand.u32 (!%p478_p7), 1, %s1709_s22  }
  0x53   : > { %481 = sbr.rel (%p478_p7) target bundleno = 825 (0x339), region = 101  ;;  %s491_s18 = scalar_lea.sflag (!%p478_p7), [#allocation4], %s1941_s11 }
  0x54   : > { %s1459_s12 = smul.u32 (!%p478_p7), 20, %s1941_s11 }
  0x55   : > { %s1460_s19 = smul.u32 (!%p478_p7), 72, %s1941_s11 }
  0x56   : > { %s486_s20 = scalar_lea.vmem (!%p478_p7), [#allocation2], %s1459_s12 }
  0x57   : > { %s1946_s16 = scalar_lea.vmem (!%p478_p7), [#allocation3], %s1460_s19 }
  0x5a   : > { %1692 = dma.done.wait (%p1877_p8), %s491_s18, 1152  }
  0x5b   : > { %1694 = vsyncadd (%p1877_p8), %s491_s18, 4294966144  ;;  %v1738_v5 = vmov 0.0   ;;  %vm1739_vm0 = vmmov 0   ;;  %v1740_v6 = vmov 0   ;;  %v1562_v7 = vld [vmem:[%s486_s20] sm:$0xff]   ;;  %v1566_v10 = vld [vmem:[%s486_s20 + $0x8] sm:$0xff]  }
  0x5c   : > { %1414 = vmatprep.subr.bf16.mxu0 %v1738_v5  ;;  %1420 = vmatprep.mubr.msk.bf16.mxu0 %vm1739_vm0, %v1738_v5  ;;  %v1563_v8 = vld [vmem:[%s1946_s16 + $0x4] ss:$8 sps:$4 sm:$0xff]   ;;  %v1565_v9 = vld [vmem:[%s1946_s16] ss:$8 sps:$4 sm:$0xff]   ;;  %vm588_vm1 = vcmask 1041408   ;;  %v1574_v17 = vld [vmem:[%s2153_s2] sm:$0xff]  }
  0x5d   : > { %754 = vmatprep.mubr.bf16.mxu1 %v1740_v6  ;;  %1560 = vset.pattern.permute.xlu0 %v1740_v6  ;;  %v1567_v11 = vld [vmem:[%s1946_s16 + $0x14] ss:$8 sps:$4 sm:$0xff]   ;;  %v1569_v12 = vld [vmem:[%s1946_s16 + $0x10] ss:$8 sps:$4 sm:$0xff]   ;;  %v1571_v14 = vld [vmem:[%s1946_s16 + $0x24] ss:$8 sps:$4 sm:$0xff]  }
  0x5e   : > { %1561 = vset.pattern.permute.xlu1 %v1740_v6  ;;  %1415 = vmatpush3.bf16.msra.mxu0 %v1562_v7  ;;  %v1570_v13 = vld [vmem:[%s486_s20 + $0x10] ss:$0 sps:$4 sm:$0x33]   ;;  %v648_v19 = vld [vmem:[%s1946_s16 + $0x40] sm:$0xff]  ;;  %vm584_vm2 = vcmask 293888   ;;  %vm715_vm3 = vcmask 1043456  }
  0x5f   : > { %722 = vmatprep.subr.bf16.mxu1 %v1563_v8  ;;  %1416 = vmatprep.subr.bf16.mxu0 %v1738_v5  ;;  %v590_v15 = vsel %vm588_vm1, %v1570_v13, 0  ;;  %v1573_v16 = vld [vmem:[%s1946_s16 + $0x20] ss:$8 sps:$4 sm:$0xff]   ;;  %v1575_v18 = vld [vmem:[%s1946_s16 + $0x34] ss:$8 sps:$4 sm:$0xff]   ;;  %v1367_v20 = vcombine.low %v648_v19, %v648_v19  ;;  %v1368_v25 = vcombine.high %v648_v19, %v648_v19  ;;  %vm711_vm4 = vcmask 588800  }
  0x60   : > { %723 = vmatpush1.bf16.msra.mxu1 %v1565_v9  ;;  %v552_v21 = vld [vmem:[%s2154_s3] sm:$0xff]  ;;  %v553_v24 = vld [vmem:[%s2154_s3 + $0x8] sm:$0xff]  ;;  %v777_v31 = vld [vmem:[%s2158_s7 + $0x10] sm:$0xff]  ;;  %vm809_vm5 = vcmask 130048   ;;  %s1351_s21 = sshll.u32 %s1941_s11, 4  ;;  %s2188_s18 = sld [smem:[#allocation18_spill]] }
  0x61   : > { %724 = vmatprep.subr.bf16.mxu1 %v1567_v11  ;;  %556 = vperm.xlu0 %1560, %v552_v21   ;;  %v649_v22 = vld [vmem:[%s2156_s5] sm:$0xff]  ;;  %v650_v26 = vld [vmem:[%s2156_s5 + $0x8] sm:$0xff]  ;;  %v717_v27 = vsel %vm715_vm3, %v1367_v20, 0  ;;  %v778_v32 = vld [vmem:[%s2158_s7 + $0x18] sm:$0xff]  ;;  %s2020_s13 = scalar_lea.vmem [#allocation6], %s1351_s21  ;;  %s1393_s21 = sshll.u32 %s1721_s25, 2 }
  0x62   : > { %1417 = vmatpush3.bf16.msra.mxu0 %v1566_v10  ;;  %v1577_v23 = vld [vmem:[%s1946_s16 + $0x30] ss:$8 sps:$4 sm:$0xff]   ;;  %653 = vperm.xlu1 %1561, %v649_v22   ;;  %v1385_v35 = vld [vmem:[%s2161_s10 + $0x10] sm:$0xff]  ;;  %s1155_s17 = sshll.u32 %s2020_s13, 4  ;;  %s2062_s29 = sadd.s32 %s1717_s24, %s1393_s21  ;;  %s2064_s17 = int_to_ptr.vmem [resolvable:$true] %s1155_s17 }
  0x63   : > { %1418 = vmatprep.subr.bf16.mxu0 %v1738_v5  ;;  %v775_v28 = vld [vmem:[%s2158_s7] sm:$0xff]  ;;  %v776_v29 = vld [vmem:[%s2158_s7 + $0x8] sm:$0xff]  ;;  %v1386_v36 = vld [vmem:[%s2161_s10 + $0x18] sm:$0xff]  ;;  %s1394_s14 = sshll.u32 %s2062_s29, 7  ;;  %s2189_s30 = sld [smem:[#allocation22_spill]] }
  0x64   : > { %725 = vmatpush1.bf16.msra.mxu1 %v1569_v12  ;;  %v1580_v30 = vld [vmem:[%s2155_s4] sm:$0xff]   ;;  %v924_v34 = vld [vmem:[%s2161_s10 + $0x8] sm:$0xff]  ;;  %s1136_s19 = scalar_lea.sflag [#allocation5], %s1941_s11  ;;  %s1631_s20 = scalar_lea.vmem %s2064_s17, 256 }
  0x65   : > { %726 = vmatprep.subr.bf16.mxu1 %v1571_v14  ;;  %561 = vperm.xlu0 %1560, %v553_v24   ;;  %v923_v33 = vld [vmem:[%s2161_s10] sm:$0xff]  ;;  %v1582_v50 = vld [vmem:[%s2157_s6 + $0x8] sm:$0xff]   ;;  %p1632_p3 = scmp.ne.s32.totalorder %s2064_s17, %s1631_s20  ;;  %s1741_s24 = smov [#allocation6]  }
  0x66   : > { %1419 = vmatpush3.bf16.msra.mxu0 %v590_v15  ;;  %658 = vperm.xlu1 %1561, %v650_v26   ;;  %v1581_v37 = vld [vmem:[%s2157_s6] sm:$0xff]   ;;  %v1584_v3 = vld [vmem:[%s2159_s8 + $0x8] sm:$0xff]   ;;  %p2190_p8 = scmp.ne.s32.totalorder %s2188_s18, 0  ;;  %s1635_s25 = sshll.u32 %s1741_s24, 4  ;;  %s1636_s25 = int_to_ptr.vmem [resolvable:$false] %s1635_s25 }
  0x67   : > { %v1583_v2 = vld [vmem:[%s2159_s8] sm:$0xff]   ;;  %p1638_p10 = scmp.lt.s32.totalorder %s2064_s17, %s1636_s25 }
  0x68   : > { %727 = vmatpush1.bf16.msra.mxu1 %v1573_v16  ;;  %v1585_v26 = vld [vmem:[%s2160_s9] sm:$0xff]   ;;  %p1633_p9 = pnand %p1632_p3, %p2190_p8 }
  0x69   : > { %1421 = vmatmul.mubr.msk.bf16.vlgmr.msra.gmra.mrb[0].mxu0 %vm584_vm2, %v1574_v17  ;;  %728 = vmatprep.subr.bf16.mxu1 %v1575_v18  ;;  %s2072_s12 = scalar_lea.hbm %s2189_s30, %s1394_s14 }
  0x6a   : > { %781 = vperm.xlu0 %1560, %v775_v28   ;;  %786 = vperm.xlu1 %1561, %v776_v29   ;;  %p1634_p12 = pneg %p1633_p9 }
  0x6b   : > { %1426 = vmatprep.mubr.msk.bf16.mxu0 %vm809_vm5, %v1581_v37 }
  0x6c   : > { %729 = vmatpush1.bf16.msra.mxu1 %v1577_v23 }
  0x6d   : > { %1369 = vmatprep.subr.msk.bf16.mxu1 %vm715_vm3, %v1368_v25 }
  0x6e   : > { %791 = vperm.xlu0 %1560, %v777_v31   ;;  %796 = vperm.xlu1 %1561, %v778_v32  }
  0x70   : > { %731 = vmatpush1.bf16.msra.mxu1 %v717_v27 }
  0x71   : > { %1436 = vmatprep.subr.bf16.mxu1 %v1738_v5 }
  0x72   : > { %927 = vperm.xlu0 %1560, %v923_v33   ;;  %932 = vperm.xlu1 %1561, %v924_v34  }
  0x73   : > { %1370 = vmatmul.mubr.msk.bf16.vlgmr.msra.gmra.mrb[0].mxu1 %vm711_vm4, %v1580_v30 }
  0x74   : > { %1438 = vmatprep.mubr.msk.bf16.mxu1 %vm1739_vm0, %v1738_v5 }
  0x76   : > { %1063 = vperm.xlu0 %1560, %v1385_v35   ;;  %1068 = vperm.xlu1 %1561, %v1386_v36   ;;  %v1586_v36 = vld [vmem:[%s2160_s9 + $0x8] sm:$0xff]  }
  0xe0   : > { %v557_v38 = vpop.permute.xlu0 %556 }
  0xe1   : > { %v654_v48 = vpop.permute.xlu1 %653 }
  0xe4   : > { %v562_v42 = vpop.permute.xlu0 %561 }
  0xe5   : > { %v659_v54 = vpop.permute.xlu1 %658 }
  0xe9   : > { %v782_v9 = vpop.permute.xlu0 %781  ;;  %v787_v11 = vpop.permute.xlu1 %786 }
  0xed   : > { %v792_v21 = vpop.permute.xlu0 %791  ;;  %v797_v24 = vpop.permute.xlu1 %796 }
 0x13c   : > { %v626_v39 = vpop.f32.mrb[0].mxu0 }
 0x13d   : > { %v627_v40 = vadd.f32 %v626_v39, %v557_v38  ;;  %v1422_v41 = vpop.f32.mrb[1].mxu0 }
 0x13e   : > { %v629_v43 = vpop.f32.mrb[2].mxu0 }
 0x13f   : > { %v2018_v44 = vmax.f32 %v627_v40, 0.0  ;;  %v630_v45 = vadd.f32 %v629_v43, %v562_v42  ;;  %v1423_v46 = vpop.f32.mrb[3].mxu0 }
 0x141   : > { %635 = vst [vmem:[%s2020_s13] sm:$0xff] %v2018_v44  ;;  %v2024_v47 = vmax.f32 %v630_v45, 0.0 }
 0x143   : > { %636 = vst [vmem:[%s2020_s13 + $0x8] sm:$0xff] %v2024_v47  ;;  %v637_v49 = vpack.c.bf16 %v2024_v47, %v2018_v44  ;;  %s1637_s13 = scalar_lea.vmem %s1636_s25, 512 }
 0x144   : > { %p1639_p11 = scmp.lt.s32.totalorder %s1637_s13, %s1631_s20 }
 0x145   : > { %1424 = vmatprep.subr.bf16.mxu0 %v637_v49 }
 0x146   : > { %v756_v51 = vpop.f32.mrb[0].mxu1  ;;  %1425 = vmatpush3.bf16.msra.mxu0 %v637_v49  ;;  %p1640_p13 = por %p1639_p11, %p1638_p10 }
 0x147   : > { %v757_v52 = vadd.f32 %v756_v51, %v654_v48  ;;  %v758_v53 = vpop.f32.mrb[1].mxu1  ;;  %1430 = vmatprep.subr.bf16.mxu0 %v1738_v5 }
 0x148   : > { %v759_v55 = vadd.f32 %v758_v53, %v654_v48  ;;  %v760_v56 = vpop.f32.mrb[2].mxu1  ;;  %p1641_p0 = pnand %p1640_p13, %p1634_p12 }
 0x149   : > { %v761_v57 = vadd.f32 %v760_v56, %v659_v54  ;;  %v762_v58 = vpop.f32.mrb[3].mxu1  ;;  %1427 = vmatmul.mubr.msk.bf16.vlgmr.msra.gmra.mrb[4].mxu0 %vm809_vm5, %v1582_v50  ;;  %v765_v60 = vmax.f32 %v757_v52, 0.0 }
 0x14a   : > { %v763_v59 = vadd.f32 %v762_v58, %v659_v54  ;;  %1432 = vmatprep.mubr.msk.bf16.mxu0 %vm1739_vm0, %v1738_v5  ;;  %v766_v62 = vmax.f32 %v759_v55, 0.0 }
 0x14b   : > { %v767_v61 = vmax.f32 %v761_v57, 0.0 }
 0x14c   : > { %v768_v63 = vmax.f32 %v763_v59, 0.0 }
 0x14d   : > { %v769_v0 = vpack.c.bf16 %v767_v61, %v765_v60 }
 0x14e   : > { %v770_v1 = vpack.c.bf16 %v768_v63, %v766_v62 }
 0x14f   : > { %1431 = vmatpush3.bf16.msra.mxu0 %v769_v0 }
 0x150   : > { %1442 = vmatprep.subr.bf16.mxu0 %v1738_v5 }
 0x152   : > { %1433 = vmatmul.mubr.msk.bf16.vlgmr.msra.gmra.mrb[8].mxu0 %vm809_vm5, %v1583_v2 }
 0x153   : > { %1443 = vmatpush3.bf16.msra.mxu0 %v770_v1  ;;  %1444 = vmatprep.mubr.msk.bf16.mxu0 %vm1739_vm0, %v1738_v5 }
 0x15a   : > { %1445 = vmatmul.mubr.msk.bf16.vlgmr.msra.gmra.mrb[12].mxu0 %vm809_vm5, %v1584_v3 }
 0x21c   : > { %v1428_v4 = vpop.f32.mrb[4].mxu0 }
 0x21d   : > { %v850_v6 = vpop.f32.mrb[5].mxu0  ;;  %v859_v22 = vadd.f32 %v1428_v4, %v792_v21 }
 0x21e   : > { %v1429_v7 = vpop.f32.mrb[6].mxu0  ;;  %v851_v10 = vadd.f32 %v850_v6, %v782_v9 }
 0x21f   : > { %v853_v8 = vpop.f32.mrb[7].mxu0  ;;  %v862_v27 = vadd.f32 %v1429_v7, %v797_v24 }
 0x220   : > { %v854_v13 = vadd.f32 %v853_v8, %v787_v11 }
 0x225   : > { %v909_v12 = vpop.f32.mrb[8].mxu0 }
 0x226   : > { %v916_v14 = vadd.f32 %v909_v12, %v851_v10  ;;  %v1434_v15 = vpop.f32.mrb[9].mxu0 }
 0x227   : > { %v912_v16 = vpop.f32.mrb[10].mxu0 }
 0x228   : > { %v917_v17 = vadd.f32 %v912_v16, %v854_v13  ;;  %v1435_v18 = vpop.f32.mrb[11].mxu0  ;;  %v918_v19 = vmax.f32 %v916_v14, 0.0 }
 0x22a   : > { %v919_v20 = vmax.f32 %v917_v17, 0.0 }
 0x22c   : > { %v922_v23 = vpack.c.bf16 %v919_v20, %v918_v19 }
 0x22d   : > { %v1043_v25 = vpop.f32.mrb[12].mxu0 }
 0x22e   : > { %v1050_v28 = vadd.f32 %v1043_v25, %v859_v22  ;;  %1437 = vmatpush3.bf16.msra.mxu1 %v922_v23  ;;  %v1446_v29 = vpop.f32.mrb[13].mxu0 }
 0x22f   : > { %v1046_v30 = vpop.f32.mrb[14].mxu0  ;;  %1448 = vmatprep.subr.bf16.mxu1 %v1738_v5 }
 0x230   : > { %v1051_v31 = vadd.f32 %v1046_v30, %v862_v27  ;;  %v1447_v32 = vpop.f32.mrb[15].mxu0  ;;  %v1052_v33 = vmax.f32 %v1050_v28, 0.0 }
 0x231   : > { %1439 = vmatmul.mubr.msk.bf16.vlgmr.msra.gmra.mrb[4].mxu1 %vm809_vm5, %v1585_v26 }
 0x232   : > { %v1053_v34 = vmax.f32 %v1051_v31, 0.0  ;;  %1450 = vmatprep.mubr.msk.bf16.mxu1 %vm1739_vm0, %v1738_v5 }
 0x234   : > { %v1057_v35 = vpack.c.bf16 %v1053_v34, %v1052_v33 }
 0x236   : > { %1449 = vmatpush3.bf16.msra.mxu1 %v1057_v35 }
 0x239   : > { %1451 = vmatmul.mubr.msk.bf16.vlgmr.msra.gmra.mrb[8].mxu1 %vm809_vm5, %v1586_v36 }
 0x23a   : > { %1644 = shalt.err (!%p1641_p0)
}
 0x23b   : > { %s1645_s16 = scalar_lea.hbm %s2072_s12, 256  ;;  %s1649_s15 = scalar_lea.hbm %s2189_s30, 1024 }
 0x23c   : > { %p1646_p1 = scmp.ne.s32.totalorder %s2072_s12, %s1645_s16  ;;  %p1650_p2 = scmp.lt.u32.totalorder %s2072_s12, %s2189_s30 }
 0x23d   : > { %p1651_p6 = scmp.lt.u32.totalorder %s1649_s15, %s1645_s16  ;;  %p1653_p3 = scmp.lt.u32.totalorder %s1645_s16, %s2072_s12 }
 0x23e   : > { %p1647_p4 = pnand %p1646_p1, %p2190_p8 }
 0x23f   : > { %p1652_p7 = por %p1651_p6, %p1650_p2 }
 0x240   : > { %p1648_p5 = pneg %p1647_p4 }
 0x241   : > { %p1654_p9 = por %p1653_p3, %p1652_p7 }
 0x243   : > { %p1655_p12 = pnand %p1654_p9, %p1648_p5 }
 0x245   : > { %1658 = shalt.err (!%p1655_p12)
}
 0x246   : > { %s1742_s20 = smov 128   ;;  %s1743_s25 = smov 256   ;;  %v928_v5 = vpop.permute.xlu0 %927  ;;  %v933_v40 = vpop.permute.xlu1 %932 }
 0x247   : > { %s1744_s13 = smov 8  }
 0x248   : > { %1463 = dma.vmem_to_hbm [thread:$0]  (%p2190_p8), %s2064_s17, 256, %s2072_s12, %s1136_s19, %s1742_s20, %s1743_s25, %s1744_s13  }
 0x249   : > { %s1352_s17 = sshll.u32 %s1941_s11, 5  ;;  %s1141_s19 = scalar_lea.sflag [#allocation8], %s1941_s11 }
 0x24a   : > { %v1064_v50 = vpop.permute.xlu0 %1063  ;;  %v1069_v54 = vpop.permute.xlu1 %1068  ;;  %s543_s12 = scalar_lea.vmem [#allocation7], %s1352_s17 }
 0x304   : > { %v977_v37 = vpop.f32.mrb[4].mxu1 }
 0x305   : > { %v978_v38 = vadd.f32 %v977_v37, %v928_v5  ;;  %v1440_v39 = vpop.f32.mrb[5].mxu1 }
 0x306   : > { %v980_v41 = vpop.f32.mrb[6].mxu1 }
 0x307   : > { %v984_v42 = vsub.f32 0.0, %v978_v38  ;;  %v981_v43 = vadd.f32 %v980_v41, %v933_v40  ;;  %v1441_v45 = vpop.f32.mrb[7].mxu1 }
 0x309   : > { %v986_v46 = vmul.f32 1.442695, %v984_v42  ;;  %v985_v48 = vsub.f32 0.0, %v981_v43 }
 0x30b   : > { %1587 = vpow2.f32 %v986_v46  ;;  %v988_v49 = vmul.f32 1.442695, %v985_v48 }
 0x30c   : > { %v1113_v51 = vpop.f32.mrb[8].mxu1 }
 0x30d   : > { %1589 = vpow2.f32 %v988_v49  ;;  %v1114_v52 = vadd.f32 %v1113_v51, %v1064_v50  ;;  %v1452_v53 = vpop.f32.mrb[9].mxu1 }
 0x30e   : > { %v1116_v55 = vpop.f32.mrb[10].mxu1 }
 0x30f   : > { %v1120_v56 = vsub.f32 0.0, %v1114_v52  ;;  %v1117_v57 = vadd.f32 %v1116_v55, %v1069_v54  ;;  %v1453_v58 = vpop.f32.mrb[11].mxu1 }
 0x311   : > { %v1122_v59 = vmul.f32 1.442695, %v1120_v56  ;;  %v1121_v60 = vsub.f32 0.0, %v1117_v57 }
 0x313   : > { %1591 = vpow2.f32 %v1122_v59  ;;  %v1124_v61 = vmul.f32 1.442695, %v1121_v60 }
 0x315   : > { %v1588_v62 = vpop.eup %1587  ;;  %1593 = vpow2.f32 %v1124_v61 }
 0x316   : > { %v990_v63 = vadd.f32 1.0, %v1588_v62 }
 0x317   : > { %v1590_v0 = vpop.eup %1589 }
 0x318   : > { %1595 = vrcp.f32 %v990_v63  ;;  %v991_v1 = vadd.f32 1.0, %v1590_v0 }
 0x31a   : > { %1597 = vrcp.f32 %v991_v1 }
 0x31d   : > { %v1592_v2 = vpop.eup %1591 }
 0x31e   : > { %v1126_v3 = vadd.f32 1.0, %v1592_v2 }
 0x31f   : > { %v1594_v4 = vpop.eup %1593 }
 0x320   : > { %1599 = vrcp.f32 %v1126_v3  ;;  %v1127_v6 = vadd.f32 1.0, %v1594_v4 }
 0x322   : > { %v1596_v7 = vpop.eup %1595  ;;  %1601 = vrcp.f32 %v1127_v6 }
 0x323   : > { %v994_v8 = vmul.f32 %v1596_v7, %v2018_v44 }
 0x324   : > { %v1598_v9 = vpop.eup %1597 }
 0x325   : > { %996 = vst [vmem:[%s543_s12] sm:$0xff] %v994_v8  ;;  %v995_v10 = vmul.f32 %v1598_v9, %v2024_v47 }
 0x327   : > { %997 = vst [vmem:[%s543_s12 + $0x8] sm:$0xff] %v995_v10 }
 0x32a   : > { %v1600_v11 = vpop.eup %1599 }
 0x32b   : > { %v1130_v12 = vmul.f32 %v1600_v11, %v2018_v44 }
 0x32c   : > { %v1602_v13 = vpop.eup %1601 }
 0x32d   : > { %1389 = vst [vmem:[%s543_s12 + $0x10] sm:$0xff] %v1130_v12  ;;  %v1131_v14 = vmul.f32 %v1602_v13, %v2024_v47 }
 0x32f   : > { %1390 = vst [vmem:[%s543_s12 + $0x18] sm:$0xff] %v1131_v14 }
 0x330   : > { %s2191_s21 = sld [smem:[#allocation23_spill]]  ;;  %s1188_s26 = sshll.u32 %s543_s12, 4  ;;  %s1189_s26 = int_to_ptr.vmem [resolvable:$true] %s1188_s26 }
 0x331   : > { %s1745_s24 = smov 256   ;;  %s1746_s20 = smov 1024  }
 0x332   : > { %1464 = sst [smem:[#allocation10]] (%p2190_p8), %s1745_s24  ;;  %s1747_s11 = smov 2  }
 0x333   : > { %1465 = sst [smem:[#allocation10 + $0x1]] (%p2190_p8), %s1746_s20  ;;  %s1748_s29 = smov 128  }
 0x334   : > { %1466 = sst [smem:[#allocation10 + $0x2]] (%p2190_p8), %s1747_s11  ;;  %s1749_s25 = smov 8  }
 0x335   : > { %1467 = sst [smem:[#allocation10 + $0x3]] (%p2190_p8), %s1748_s29  ;;  %s1751_s13 = smov 0  }
 0x336   : > { %s1171_s15 = scalar_lea.hbm %s2191_s21, %s1394_s14  ;;  %1468 = sst [smem:[#allocation10 + $0x4]] (%p2190_p8), %s1745_s24 }
 0x337   : > { %1469 = sst [smem:[#allocation10 + $0x5]] (%p2190_p8), %s1749_s25  ;;  %s1750_s14 = smov [#allocation9]  }
 0x338   : > { %1470 = dma.general (%p2190_p8), %s1189_s26, 512, %s1171_s15, %s1141_s19, %s1750_s14, [#allocation10], %s1751_s13, 0  }
 0x339 PF: > { %s2192_s17 = sld [smem:[#allocation14_spill]]  ;;  %s2193_s12 = sld [smem:[#allocation19_spill]] }
 0x33a   : > { %p1480_p10 = scmp.ge.s32.totalorder %s1733_s28, 2 }
 0x33f   : > { %s1216_s16 = sand.u32 1, %s2192_s17   ;;  %p2194_p11 = scmp.ne.s32.totalorder %s2193_s12, 0 }
 0x340   : > { %s1217_s0 = scalar_lea.sflag [#allocation5], %s1216_s16 }
 0x341   : > { %p1474_p13 = pnand %p1480_p10, %p2194_p11 }
 0x343   : > { %1696 = dma.done.wait (!%p1474_p13), %s1217_s0, 256  }
 0x344   : > { %1698 = vsyncadd (!%p1474_p13), %s1217_s0, 4294967040  ;;  %s1226_s21 = scalar_lea.sflag [#allocation8], %s1216_s16 }
 0x345   : > { %1700 = dma.done.wait (!%p1474_p13), %s1226_s21, 512  }
 0x346   : > { %1702 = vsyncadd (!%p1474_p13), %s1226_s21, 4294966784  ;;  %s32_s28 = sadd.s32 1, %s1733_s28   ;;  %s2195_s18 = sld [smem:[#allocation20_spill]] }
 0x347   : > { %p29_p0 = scmp.ge.s32.totalorder %s32_s28, 6   ;;  %s2196_s24 = sld [smem:[#allocation15_spill]] }
 0x348   : > { %s2197_s26 = sld [smem:[#allocation16_spill]]  ;;  %s2198_s19 = sld [smem:[#allocation17_spill]] }
 0x349   : > { %s2199_s21 = smov %s1709_s22  ;;  %s2200_s22 = smov %s1713_s23 }
 0x34a   : > { %s2202_s25 = smov %s1729_s27  ;;  %31 = sbr.rel (!%p29_p0) target bundleno = 13 (0xd), region = 184 }
 0x34c   : > { %s2201_s23 = smov %s2195_s18 }
 0x34e   : > { %s2203_s27 = smov %s2198_s19 }
 0x351   :  { %1231 = vsyncpa [#allocation4], 1 }
 0x352   :  { %1233 = vsyncpa [#allocation4 + $0x1], 1 }
 0x353   :  { %1234 = vsyncpa [#allocation5], 1 }
 0x354   :  { %1236 = vsyncpa [#allocation5 + $0x1], 1 }
 0x355   :  { %1237 = vsyncpa [#allocation8], 1 }
 0x356   :  { %1239 = vsyncpa [#allocation8 + $0x1], 1 }

</bundles_post_ra>
